<compile_context>
chip_gen: v6e
topology: v6e:2x2x1
jax: 0.10.0
libtpu: 0.0.40
codegen_flags: <defaults>
</compile_context>

<pallas_src>
import jax
import jax.numpy as jnp
from jax.experimental import pallas as pl
from jax.experimental.pallas import tpu as pltpu


LANE = 128
# Per-tile input budget (Pallas double-buffers, so ~2x this lives in VMEM);
# comfortably under the 32 MiB scoped default and v7x's 64 MiB physical VMEM.
_VMEM_TILE_BUDGET = 8 * 1024 * 1024


def _round_up(a, b):
    return (a + b - 1) // b * b


def _pad_min(dtype):
    """Identity element for max() in the given dtype (used to pad clipped windows)."""
    dtype = jnp.dtype(dtype)
    if jnp.issubdtype(dtype, jnp.floating):
        return float("-inf")
    if jnp.issubdtype(dtype, jnp.integer):
        return int(jnp.iinfo(dtype).min)
    if dtype == jnp.bool_:
        return False
    raise TypeError(f"unsupported dtype {dtype}")


def _make_maxpool_kernel(kh, kw):
    """Max over the (KH, KW) window axes of a (OH, KH, OW, KW, T) block."""

    def kernel(x_ref, o_ref):
        # Seed with an in-window element (keeps integer dtypes exact).
        m = x_ref[:, 0:1, :, 0:1, :]          # (OH, 1, OW, 1, T)
        for dh in range(kh):
            for dw in range(kw):
                if dh == 0 and dw == 0:
                    continue
                m = jnp.maximum(m, x_ref[:, dh:dh + 1, :, dw:dw + 1, :])
        o_ref[...] = m                         # single full-tile, lane-dense store

    return kernel


def maxpool2d_ceil(x, ksize=3, stride=None):
    """MaxPool2d(kernel_size=ksize, stride=ksize, ceil_mode=True) on NCHW input."""
    if stride is None:
        stride = ksize
    # TODO(synk): only stride == kernel_size (the PyTorch default used by MyModule)
    # is implemented; general strides would need overlapping-window handling.
    assert stride == ksize, "only stride == kernel_size is supported"

    n, c, h, w = x.shape
    k = ksize

    # ceil_mode output size + PyTorch rule: last window must start inside input.
    oh = -(-(h - k) // stride) + 1
    ow = -(-(w - k) // stride) + 1
    if (oh - 1) * stride >= h:
        oh -= 1
    if (ow - 1) * stride >= w:
        ow -= 1

    hp, wp = oh * k, ow * k                    # padded spatial extents (>= h, w)
    nc = n * c
    pad_val = _pad_min(x.dtype)
    itemsize = jnp.dtype(x.dtype).itemsize

    # Pick a lane tile: multiple of 128, as large as fits the VMEM budget.
    ncp128 = _round_up(nc, LANE)
    tile_nc = LANE
    for cand in (1024, 512, 256, 128):
        if cand <= ncp128 and oh * k * ow * k * cand * itemsize <= _VMEM_TILE_BUDGET:
            tile_nc = cand
            break
    ncp = _round_up(nc, tile_nc)

    # NCHW -> (H, W, NC): NC on the lane axis.
    x_hwc = jnp.transpose(x, (2, 3, 0, 1)).reshape(h, w, nc)
    # Pad clipped windows with the dtype minimum; pad NC up to the tile multiple.
    x_pad = jnp.pad(
        x_hwc,
        ((0, hp - h), (0, wp - w), (0, ncp - nc)),
        mode="constant",
        constant_values=pad_val,
    )
    # Free (row-major) reshape: split each spatial axis into (out, window).
    x5 = x_pad.reshape(oh, k, ow, k, ncp)

    kernel = _make_maxpool_kernel(k, k)

    out5 = pl.pallas_call(
        kernel,
        out_shape=jax.ShapeDtypeStruct((oh, 1, ow, 1, ncp), x.dtype),
        grid=(ncp // tile_nc,),
        in_specs=[
            pl.BlockSpec((oh, k, ow, k, tile_nc), lambda i: (0, 0, 0, 0, i)),
        ],
        out_specs=pl.BlockSpec((oh, 1, ow, 1, tile_nc), lambda i: (0, 0, 0, 0, i)),
        compiler_params=pltpu.CompilerParams(dimension_semantics=("parallel",)),
    )(x5)

    out = out5.reshape(oh, ow, ncp)[:, :, :nc]          # drop NC padding
    out = jnp.transpose(out, (2, 0, 1)).reshape(n, c, oh, ow)
    return out


class MyModuleJax:
    """JAX/Pallas equivalent of the PyTorch MyModule (MaxPool2d(3, ceil_mode=True))."""

    def __init__(self):
        self.ksize = 3
        self.stride = 3  # PyTorch default stride = kernel_size

    def __call__(self, x):
        return maxpool2d_ceil(x, self.ksize, self.stride)


def _reference_maxpool(x, ksize=3, stride=3):
    """Pure-JAX reference (ceil_mode, float inputs) for correctness checking."""
    n, c, h, w = x.shape
    oh = -(-(h - ksize) // stride) + 1
    ow = -(-(w - ksize) // stride) + 1
    out = jnp.full((n, c, oh, ow), -jnp.inf, dtype=x.dtype)
    for i in range(oh):
        for j in range(ow):
            h0, w0 = i * stride, j * stride
            h1, w1 = min(h0 + ksize, h), min(w0 + ksize, w)
            win = x[:, :, h0:h1, w0:w1]
            out = out.at[:, :, i, j].set(jnp.max(win, axis=(2, 3)))
    return out


if __name__ == "__main__":
    module = MyModuleJax()

    # Shape implied by the PyTorch script: input reshaped to (-1, 1, 5, 5).
    key = jax.random.PRNGKey(0)
    x = jax.random.normal(key, (2, 1, 5, 5), dtype=jnp.float32)
    out = jax.block_until_ready(module(x))
    ref = _reference_maxpool(x)
    assert out.shape == (2, 1, 2, 2), out.shape
    assert jnp.allclose(out, ref), (out, ref)

    # Slightly larger case exercising ceil_mode edge-clipping and NC > 1.
    x2 = jax.random.normal(jax.random.PRNGKey(1), (3, 4, 7, 7), dtype=jnp.float32)
    out2 = jax.block_until_ready(module(x2))
    ref2 = _reference_maxpool(x2)
    assert out2.shape == (3, 4, 3, 3), out2.shape
    assert jnp.allclose(out2, ref2), (out2, ref2)

    print("KERNEL_OK")
</pallas_src>

<mosaic_0001>
module attributes {stable_mosaic.version = 11 : i64} {
  func.func @kernel(%arg0: i32, %arg1: memref<2x3x2x3x128xf32, #tpu.memory_space<vmem>>, %arg2: memref<2x1x2x1x128xf32, #tpu.memory_space<vmem>>) attributes {dimension_semantics = [#tpu.dimension_semantics<parallel>], iteration_bounds = array<i64: 1>, scalar_prefetch = 0 : i64, scratch_operands = 0 : i64, tpu.core_type = #tpu.core_type<tc>, window_params = [{transform_indices = @transform_0, window_bounds = array<i64: 2, 3, 2, 3, 128>}, {transform_indices = @transform_1, window_bounds = array<i64: 2, 1, 2, 1, 128>}]} {
    %c0 = arith.constant 0 : index
    %c0_0 = arith.constant 0 : index
    %c0_1 = arith.constant 0 : index
    %c0_2 = arith.constant 0 : index
    %c0_3 = arith.constant 0 : index
    %0 = vector.load %arg1[%c0, %c0_0, %c0_1, %c0_2, %c0_3] : memref<2x3x2x3x128xf32, #tpu.memory_space<vmem>>, vector<2x1x2x1x128xf32>
    %c0_4 = arith.constant 0 : index
    %c0_5 = arith.constant 0 : index
    %c0_6 = arith.constant 0 : index
    %c1 = arith.constant 1 : index
    %c0_7 = arith.constant 0 : index
    %1 = vector.load %arg1[%c0_4, %c0_5, %c0_6, %c1, %c0_7] : memref<2x3x2x3x128xf32, #tpu.memory_space<vmem>>, vector<2x1x2x1x128xf32>
    %2 = arith.maximumf %0, %1 : vector<2x1x2x1x128xf32>
    %c0_8 = arith.constant 0 : index
    %c0_9 = arith.constant 0 : index
    %c0_10 = arith.constant 0 : index
    %c2 = arith.constant 2 : index
    %c0_11 = arith.constant 0 : index
    %3 = vector.load %arg1[%c0_8, %c0_9, %c0_10, %c2, %c0_11] : memref<2x3x2x3x128xf32, #tpu.memory_space<vmem>>, vector<2x1x2x1x128xf32>
    %4 = arith.maximumf %2, %3 : vector<2x1x2x1x128xf32>
    %c0_12 = arith.constant 0 : index
    %c1_13 = arith.constant 1 : index
    %c0_14 = arith.constant 0 : index
    %c0_15 = arith.constant 0 : index
    %c0_16 = arith.constant 0 : index
    %5 = vector.load %arg1[%c0_12, %c1_13, %c0_14, %c0_15, %c0_16] : memref<2x3x2x3x128xf32, #tpu.memory_space<vmem>>, vector<2x1x2x1x128xf32>
    %6 = arith.maximumf %4, %5 : vector<2x1x2x1x128xf32>
    %c0_17 = arith.constant 0 : index
    %c1_18 = arith.constant 1 : index
    %c0_19 = arith.constant 0 : index
    %c1_20 = arith.constant 1 : index
    %c0_21 = arith.constant 0 : index
    %7 = vector.load %arg1[%c0_17, %c1_18, %c0_19, %c1_20, %c0_21] : memref<2x3x2x3x128xf32, #tpu.memory_space<vmem>>, vector<2x1x2x1x128xf32>
    %8 = arith.maximumf %6, %7 : vector<2x1x2x1x128xf32>
    %c0_22 = arith.constant 0 : index
    %c1_23 = arith.constant 1 : index
    %c0_24 = arith.constant 0 : index
    %c2_25 = arith.constant 2 : index
    %c0_26 = arith.constant 0 : index
    %9 = vector.load %arg1[%c0_22, %c1_23, %c0_24, %c2_25, %c0_26] : memref<2x3x2x3x128xf32, #tpu.memory_space<vmem>>, vector<2x1x2x1x128xf32>
    %10 = arith.maximumf %8, %9 : vector<2x1x2x1x128xf32>
    %c0_27 = arith.constant 0 : index
    %c2_28 = arith.constant 2 : index
    %c0_29 = arith.constant 0 : index
    %c0_30 = arith.constant 0 : index
    %c0_31 = arith.constant 0 : index
    %11 = vector.load %arg1[%c0_27, %c2_28, %c0_29, %c0_30, %c0_31] : memref<2x3x2x3x128xf32, #tpu.memory_space<vmem>>, vector<2x1x2x1x128xf32>
    %12 = arith.maximumf %10, %11 : vector<2x1x2x1x128xf32>
    %c0_32 = arith.constant 0 : index
    %c2_33 = arith.constant 2 : index
    %c0_34 = arith.constant 0 : index
    %c1_35 = arith.constant 1 : index
    %c0_36 = arith.constant 0 : index
    %13 = vector.load %arg1[%c0_32, %c2_33, %c0_34, %c1_35, %c0_36] : memref<2x3x2x3x128xf32, #tpu.memory_space<vmem>>, vector<2x1x2x1x128xf32>
    %14 = arith.maximumf %12, %13 : vector<2x1x2x1x128xf32>
    %c0_37 = arith.constant 0 : index
    %c2_38 = arith.constant 2 : index
    %c0_39 = arith.constant 0 : index
    %c2_40 = arith.constant 2 : index
    %c0_41 = arith.constant 0 : index
    %15 = vector.load %arg1[%c0_37, %c2_38, %c0_39, %c2_40, %c0_41] : memref<2x3x2x3x128xf32, #tpu.memory_space<vmem>>, vector<2x1x2x1x128xf32>
    %16 = arith.maximumf %14, %15 : vector<2x1x2x1x128xf32>
    %c0_42 = arith.constant 0 : index
    %c0_43 = arith.constant 0 : index
    %c0_44 = arith.constant 0 : index
    %c0_45 = arith.constant 0 : index
    %c0_46 = arith.constant 0 : index
    %17 = vector.load %arg2[%c0_42, %c0_43, %c0_44, %c0_45, %c0_46] : memref<2x1x2x1x128xf32, #tpu.memory_space<vmem>>, vector<2x1x2x1x128xf32>
    tpu.vector_store %arg2[%c0_42, %c0_43, %c0_44, %c0_45, %c0_46], %16 {strides = array<i32>} : memref<2x1x2x1x128xf32, #tpu.memory_space<vmem>>, vector<2x1x2x1x128xf32>,
    return
  }
  func.func @transform_0(%arg0: i32) -> (i32, i32, i32, i32, i32) {
    %c0_i32 = arith.constant 0 : i32
    %c0_i32_0 = arith.constant 0 : i32
    %c0_i32_1 = arith.constant 0 : i32
    %c0_i32_2 = arith.constant 0 : i32
    %c0_i32_3 = arith.constant 0 : i32
    return %c0_i32, %c0_i32_0, %c0_i32_1, %c0_i32_2, %arg0 : i32, i32, i32, i32, i32
  }
  func.func @transform_1(%arg0: i32) -> (i32, i32, i32, i32, i32) {
    %c0_i32 = arith.constant 0 : i32
    %c0_i32_0 = arith.constant 0 : i32
    %c0_i32_1 = arith.constant 0 : i32
    %c0_i32_2 = arith.constant 0 : i32
    %c0_i32_3 = arith.constant 0 : i32
    return %c0_i32, %c0_i32_0, %c0_i32_1, %c0_i32_2, %arg0 : i32, i32, i32, i32, i32
  }
}

</mosaic_0001>

<bundles_post_ra>
// kernel: tpu_custom_call.1
= control target key start
LH: loop header
LB: loop body
LE: loop exit
PB: predicated region body
PF: predicated region fallthrough
CT: control target
= control target key end

     0   :  { %s272_s0 = inlined_call_operand.vmem [shape: f32[2,3,2,3,128], index: 0, kind: input, shape index: {}]   ;;  %s273_s1 = inlined_call_operand.hbm [shape: f32[2,1,2,1,128], index: 1, kind: output, shape index: {}]  }
   0x1   :  { %v9_v0 = vld [vmem:[%s272_s0] sm:$0x1]  ;;  %v13_v1 = vld [vmem:[%s272_s0 + $0x1] sm:$0x1]  ;;  %v21_v2 = vld [vmem:[%s272_s0 + $0x2] sm:$0x1] }
   0x2   :  { %v17_v3 = vmax.f32 %v9_v0, %v13_v1  ;;  %v99_v4 = vld [vmem:[%s272_s0 + $0x8] sm:$0x1]  ;;  %v10_v6 = vld [vmem:[%s272_s0 + $0x4] sm:$0x1]  ;;  %v14_v7 = vld [vmem:[%s272_s0 + $0x5] sm:$0x1] }
   0x3   :  { %v22_v8 = vld [vmem:[%s272_s0 + $0x6] sm:$0x1]  ;;  %v103_v9 = vld [vmem:[%s272_s0 + $0x9] sm:$0x1]  ;;  %v18_v10 = vmax.f32 %v10_v6, %v14_v7  ;;  %v107_v12 = vld [vmem:[%s272_s0 + $0xa] sm:$0x1] }
   0x4   :  { %v25_v5 = vmax.f32 %v17_v3, %v21_v2  ;;  %v100_v13 = vld [vmem:[%s272_s0 + $0xc] sm:$0x1]  ;;  %v11_v15 = vld [vmem:[%s272_s0 + $0x18] sm:$0x1]  ;;  %v15_v16 = vld [vmem:[%s272_s0 + $0x19] sm:$0x1] }
   0x5   :  { %v26_v14 = vmax.f32 %v18_v10, %v22_v8  ;;  %v23_v17 = vld [vmem:[%s272_s0 + $0x1a] sm:$0x1]  ;;  %v104_v19 = vld [vmem:[%s272_s0 + $0xd] sm:$0x1]  ;;  %v19_v20 = vmax.f32 %v11_v15, %v15_v16  ;;  %v111_v21 = vld [vmem:[%s272_s0 + $0x10] sm:$0x1] }
   0x6   :  { %v34_v11 = vmax.f32 %v25_v5, %v99_v4  ;;  %v108_v23 = vld [vmem:[%s272_s0 + $0xe] sm:$0x1]  ;;  %v101_v24 = vld [vmem:[%s272_s0 + $0x20] sm:$0x1]  ;;  %v12_v27 = vld [vmem:[%s272_s0 + $0x1c] sm:$0x1] }
   0x7   :  { %v35_v22 = vmax.f32 %v26_v14, %v100_v13  ;;  %v27_v26 = vmax.f32 %v19_v20, %v23_v17  ;;  %v16_v28 = vld [vmem:[%s272_s0 + $0x1d] sm:$0x1]  ;;  %v24_v29 = vld [vmem:[%s272_s0 + $0x1e] sm:$0x1]  ;;  %v115_v30 = vld [vmem:[%s272_s0 + $0x11] sm:$0x1] }
   0x8   :  { %v42_v18 = vmax.f32 %v34_v11, %v103_v9  ;;  %v105_v32 = vld [vmem:[%s272_s0 + $0x21] sm:$0x1]  ;;  %v20_v33 = vmax.f32 %v12_v27, %v16_v28  ;;  %v112_v35 = vld [vmem:[%s272_s0 + $0x14] sm:$0x1]  ;;  %v102_v37 = vld [vmem:[%s272_s0 + $0x24] sm:$0x1] }
   0x9   :  { %v43_v31 = vmax.f32 %v35_v22, %v104_v19  ;;  %v36_v36 = vmax.f32 %v27_v26, %v101_v24  ;;  %v119_v38 = vld [vmem:[%s272_s0 + $0x12] sm:$0x1]  ;;  %v109_v40 = vld [vmem:[%s272_s0 + $0x22] sm:$0x1] }
   0xa   :  { %v50_v25 = vmax.f32 %v42_v18, %v107_v12  ;;  %v28_v41 = vmax.f32 %v20_v33, %v24_v29 }
   0xb   :  { %v51_v39 = vmax.f32 %v43_v31, %v108_v23 }
   0xc   :  { %v59_v34 = vmax.f32 %v50_v25, %v111_v21 }
   0xd   :  { %6 = vsyncpa [#allocation3], 0  ;;  %v116_v43 = vld [vmem:[%s272_s0 + $0x15] sm:$0x1]  ;;  %v44_v44 = vmax.f32 %v36_v36, %v105_v32  ;;  %v106_v45 = vld [vmem:[%s272_s0 + $0x25] sm:$0x1]  ;;  %v60_v46 = vmax.f32 %v51_v39, %v112_v35  ;;  %v37_v48 = vmax.f32 %v28_v41, %v102_v37 }
   0xe   :  { %v67_v42 = vmax.f32 %v59_v34, %v115_v30  ;;  %v113_v47 = vld [vmem:[%s272_s0 + $0x28] sm:$0x1]  ;;  %v120_v50 = vld [vmem:[%s272_s0 + $0x16] sm:$0x1]  ;;  %v110_v52 = vld [vmem:[%s272_s0 + $0x26] sm:$0x1] }
   0xf   :  { %v52_v51 = vmax.f32 %v44_v44, %v109_v40  ;;  %v68_v53 = vmax.f32 %v60_v46, %v116_v43  ;;  %v117_v54 = vld [vmem:[%s272_s0 + $0x29] sm:$0x1]  ;;  %v45_v55 = vmax.f32 %v37_v48, %v106_v45  ;;  %v114_v57 = vld [vmem:[%s272_s0 + $0x2c] sm:$0x1]  ;;  %v121_v59 = vld [vmem:[%s272_s0 + $0x2a] sm:$0x1] }
  0x10   :  { %v75_v49 = vmax.f32 %v67_v42, %v119_v38  ;;  %v118_v62 = vld [vmem:[%s272_s0 + $0x2d] sm:$0x1]  ;;  %v122_v1 = vld [vmem:[%s272_s0 + $0x2e] sm:$0x1]  ;;  %s148_s20 = smov [#allocation2]  }
  0x11   :  { %v61_v56 = vmax.f32 %v52_v51, %v113_v47  ;;  %v76_v58 = vmax.f32 %v68_v53, %v120_v50  ;;  %v53_v60 = vmax.f32 %v45_v55, %v110_v52  ;;  %s88_s21 = sshll.u32 %s148_s20, 4  ;;  %s89_s21 = int_to_ptr.vmem [resolvable:$true] %s88_s21 }
  0x12   :  { %79 = vst [vmem:[#allocation2] sm:$0x1] %v75_v49  ;;  %s126_s22 = scalar_lea.vmem %s89_s21, 64  ;;  %p131_p1 = scmp.lt.s32.totalorder %s89_s21, %s89_s21 }
  0x13   :  { %v69_v61 = vmax.f32 %v61_v56, %v117_v54  ;;  %80 = vst [vmem:[#allocation2 + $0x1] sm:$0x1] %v76_v58  ;;  %v62_v63 = vmax.f32 %v53_v60, %v114_v57  ;;  %p127_p0 = scmp.ne.s32.totalorder %s89_s21, %s126_s22  ;;  %p132_p2 = scmp.lt.s32.totalorder %s126_s22, %s126_s22 }
  0x15   :  { %v77_v0 = vmax.f32 %v69_v61, %v121_v59  ;;  %v70_v2 = vmax.f32 %v62_v63, %v118_v62  ;;  %p133_p3 = por %p132_p2, %p131_p1 }
  0x17   :  { %81 = vst [vmem:[#allocation2 + $0x2] sm:$0x1] %v77_v0  ;;  %v78_v3 = vmax.f32 %v70_v2, %v122_v1  ;;  %p134_p4 = pnand %p133_p3, %p127_p0 }
  0x19   :  { %82 = vst [vmem:[#allocation2 + $0x3] sm:$0x1] %v78_v3 }
  0x1a   :  { %137 = shalt.err (!%p134_p4)
}
  0x1b   :  { %s149_s23 = smov 16   ;;  %s150_s24 = smov 1  }
  0x1c   :  { %94 = dma.vmem_to_hbm [thread:$0]  %s89_s21, 64, %s273_s1, [#allocation3], %s149_s23, %s149_s23, %s150_s24  }
  0x1d   :  { %146 = dma.done.wait [#allocation3], 64  }
  0x1e   :  { %147 = vsyncadd [#allocation3], 4294967232 }
  0x1f   :  { %98 = vsyncpa [#allocation3], 1 }

</bundles_post_ra>
